<compile_context>
chip_gen: v5e
topology: v5e:2x2
jax: 0.10.0
libtpu: 0.0.40
codegen_flags: <defaults>
</compile_context>

<pallas_src>
import functools

import numpy as np
import jax
import jax.numpy as jnp
from jax.experimental import pallas as pl
from jax.experimental.pallas import tpu as pltpu


# ----------------------------------------------------------------------------
# Pallas kernel
# ----------------------------------------------------------------------------
def _blur_kernel(x_ref, o_ref, xp_ref, tmp_ref, *, h_taps, v_taps, pad0):
    """Separable depthwise FIR on a (TB, H, W) tile, padding folded in."""
    TB, H, W = x_ref.shape
    _, OH, OW = o_ref.shape
    K = len(h_taps)

    # Fold the zero padding into the kernel: interior write into a zeroed
    # VMEM scratch (replaces the old jnp.pad / extra HBM traversal).
    xp_ref[...] = jnp.zeros_like(xp_ref)
    xp_ref[:, pad0:pad0 + H, pad0:pad0 + W] = x_ref[...].astype(jnp.float32)

    # Horizontal 1-D pass (shifts along the lane axis).
    acc_h = xp_ref[:, :, 0:OW] * h_taps[0]
    for dw in range(1, K):
        acc_h = acc_h + xp_ref[:, :, dw:dw + OW] * h_taps[dw]
    tmp_ref[...] = acc_h

    # Vertical 1-D pass (shifts along the sublane axis).
    acc_v = tmp_ref[:, 0:OH, :] * v_taps[0]
    for dh in range(1, K):
        acc_v = acc_v + tmp_ref[:, dh:dh + OH, :] * v_taps[dh]
    o_ref[...] = acc_v.astype(o_ref.dtype)


# ----------------------------------------------------------------------------
# Wrapper
# ----------------------------------------------------------------------------
def _choose_block(nc, unit_bytes, budget_bytes=8 << 20):
    """Largest divisor of nc that fits the VMEM budget; prefer >=2 grid steps
    (enables double-buffer pipelining and v7x megacore sharding)."""
    divs = [d for d in range(1, nc + 1) if nc % d == 0]
    fitting = [d for d in divs if d * unit_bytes <= budget_bytes] or [1]
    split = [d for d in fitting if nc // d >= 2]
    return max(split) if split else max(fitting)


def blur_forward(x_nchw, kernel_1d, pad, upsample_factor=1):
    """Pallas implementation of Blur.forward (upfirdn2d with up=down=1)."""
    N, C, H, W = x_nchw.shape
    pad0, pad1 = int(pad[0]), int(pad[1])
    assert pad0 >= 0 and pad1 >= 0

    k = np.asarray(kernel_1d, dtype=np.float64)
    # TODO(synk): non-separable 2-D kernels (make_kernel also accepts them)
    # would need the full KxK tap loop; Blur in invad.py always uses 1-D taps.
    assert k.ndim == 1
    K = int(k.shape[0])
    t = (k / k.sum())[::-1]                 # upfirdn2d correlates with flip(k)
    gain = float(upsample_factor) ** 2
    h_taps = tuple(float(v) for v in t)
    v_taps = tuple(float(v) * gain for v in t)

    Hp, Wp = H + pad0 + pad1, W + pad0 + pad1
    OH, OW = Hp - K + 1, Wp - K + 1
    assert OH > 0 and OW > 0

    NC = N * C
    x = x_nchw.reshape(NC, H, W)

    # Per-unit-of-TB VMEM bytes: double-buffered in/out blocks + the two
    # f32 scratch slabs (padded tile and horizontal-pass intermediate).
    unit_bytes = 4 * (2 * H * W + 2 * OH * OW + Hp * Wp + Hp * OW)
    TB = _choose_block(NC, unit_bytes)
    grid = (NC // TB,)
    vmem_limit = int(min(64 << 20, max(32 << 20, 2 * TB * unit_bytes)))

    kern = functools.partial(_blur_kernel, h_taps=h_taps, v_taps=v_taps,
                             pad0=pad0)
    out = pl.pallas_call(
        kern,
        out_shape=jax.ShapeDtypeStruct((NC, OH, OW), x_nchw.dtype),
        grid_spec=pltpu.PrefetchScalarGridSpec(
            num_scalar_prefetch=0,
            grid=grid,
            in_specs=[pl.BlockSpec((TB, H, W), lambda i: (i, 0, 0))],
            out_specs=pl.BlockSpec((TB, OH, OW), lambda i: (i, 0, 0)),
            scratch_shapes=[pltpu.VMEM((TB, Hp, Wp), jnp.float32),
                            pltpu.VMEM((TB, Hp, OW), jnp.float32)]),
        compiler_params=pltpu.CompilerParams(
            dimension_semantics=("parallel",),
            vmem_limit_bytes=vmem_limit),
    )(x)
    return out.reshape(N, C, OH, OW)


# ----------------------------------------------------------------------------
# Pure-JAX reference (upfirdn2d_native with up=down=1)
# ----------------------------------------------------------------------------
def blur_reference(x_nchw, kernel_1d, pad, upsample_factor=1):
    N, C, H, W = x_nchw.shape
    k = jnp.asarray(kernel_1d, jnp.float32)
    k2 = jnp.outer(k, k)
    k2 = k2 / jnp.sum(k2)
    k2 = k2 * (float(upsample_factor) ** 2)
    w = k2[::-1, ::-1]                      # conv2d with the flipped kernel
    w = jnp.broadcast_to(w[None, None], (C, 1, k2.shape[0], k2.shape[1]))
    out = jax.lax.conv_general_dilated(
        x_nchw.astype(jnp.float32), w.astype(jnp.float32),
        window_strides=(1, 1),
        padding=((pad[0], pad[1]), (pad[0], pad[1])),
        dimension_numbers=("NCHW", "OIHW", "NCHW"),
        feature_group_count=C)
    return out.astype(x_nchw.dtype)


# ----------------------------------------------------------------------------
# Main
# ----------------------------------------------------------------------------
if __name__ == "__main__":
    key = jax.random.PRNGKey(0)
    x = jax.random.normal(key, (2, 4, 16, 16), jnp.float32)

    configs = [
        # (kernel, pad, upsample_factor) — the invad/StyleGAN2 use cases.
        ([1.0, 3.0, 3.0, 1.0], (2, 1), 2),   # Blur following an upsample path
        ([1.0, 3.0, 3.0, 1.0], (1, 1), 1),   # plain anti-alias blur
    ]
    for kernel, pad, up in configs:
        out = blur_forward(x, kernel, pad, upsample_factor=up)
        out = jax.block_until_ready(out)
        ref = blur_reference(x, kernel, pad, upsample_factor=up)
        assert out.shape == ref.shape, (out.shape, ref.shape)
        assert bool(jnp.all(jnp.isfinite(out)))
        err = float(jnp.max(jnp.abs(out - ref)))
        assert bool(jnp.allclose(out, ref, rtol=1e-5, atol=1e-5)), err

    print("KERNEL_OK")
</pallas_src>

<mosaic_0001>
module attributes {stable_mosaic.version = 11 : i64} {
  func.func @_blur_kernel(%arg0: i32, %arg1: memref<4x16x16xf32, #tpu.memory_space<vmem>>, %arg2: memref<4x16x16xf32, #tpu.memory_space<vmem>>, %arg3: memref<4x19x19xf32, #tpu.memory_space<vmem>>, %arg4: memref<4x19x16xf32, #tpu.memory_space<vmem>>) attributes {dimension_semantics = [#tpu.dimension_semantics<parallel>], iteration_bounds = array<i64: 2>, scalar_prefetch = 0 : i64, scratch_operands = 2 : i64, tpu.core_type = #tpu.core_type<tc>, window_params = [{transform_indices = @transform_0, window_bounds = array<i64: 4, 16, 16>}, {transform_indices = @transform_1, window_bounds = array<i64: 4, 16, 16>}]} {
    %cst = arith.constant 0.000000e+00 : f32
    %0 = vector.broadcast %cst : f32 to vector<4x19x19xf32>
    %c0 = arith.constant 0 : index
    %c0_0 = arith.constant 0 : index
    %c0_1 = arith.constant 0 : index
    %1 = vector.load %arg3[%c0, %c0_0, %c0_1] : memref<4x19x19xf32, #tpu.memory_space<vmem>>, vector<4x19x19xf32>
    tpu.vector_store %arg3[%c0, %c0_0, %c0_1], %0 {strides = array<i32>} : memref<4x19x19xf32, #tpu.memory_space<vmem>>, vector<4x19x19xf32>,
    %c0_2 = arith.constant 0 : index
    %c0_3 = arith.constant 0 : index
    %c0_4 = arith.constant 0 : index
    %2 = vector.load %arg1[%c0_2, %c0_3, %c0_4] : memref<4x16x16xf32, #tpu.memory_space<vmem>>, vector<4x16x16xf32>
    %c0_5 = arith.constant 0 : index
    %c2 = arith.constant 2 : index
    %c2_6 = arith.constant 2 : index
    %3 = vector.load %arg3[%c0_5, %c2, %c2_6] : memref<4x19x19xf32, #tpu.memory_space<vmem>>, vector<4x16x16xf32>
    tpu.vector_store %arg3[%c0_5, %c2, %c2_6], %2 {strides = array<i32>} : memref<4x19x19xf32, #tpu.memory_space<vmem>>, vector<4x16x16xf32>,
    %c0_7 = arith.constant 0 : index
    %c0_8 = arith.constant 0 : index
    %c0_9 = arith.constant 0 : index
    %4 = vector.load %arg3[%c0_7, %c0_8, %c0_9] : memref<4x19x19xf32, #tpu.memory_space<vmem>>, vector<4x19x16xf32>
    %cst_10 = arith.constant 1.250000e-01 : f32
    %5 = vector.broadcast %cst_10 : f32 to vector<4x19x16xf32>
    %6 = arith.mulf %4, %5 : vector<4x19x16xf32>
    %c0_11 = arith.constant 0 : index
    %c0_12 = arith.constant 0 : index
    %c1 = arith.constant 1 : index
    %7 = vector.load %arg3[%c0_11, %c0_12, %c1] : memref<4x19x19xf32, #tpu.memory_space<vmem>>, vector<4x19x16xf32>
    %cst_13 = arith.constant 3.750000e-01 : f32
    %8 = vector.broadcast %cst_13 : f32 to vector<4x19x16xf32>
    %9 = arith.mulf %7, %8 : vector<4x19x16xf32>
    %10 = arith.addf %6, %9 : vector<4x19x16xf32>
    %c0_14 = arith.constant 0 : index
    %c0_15 = arith.constant 0 : index
    %c2_16 = arith.constant 2 : index
    %11 = vector.load %arg3[%c0_14, %c0_15, %c2_16] : memref<4x19x19xf32, #tpu.memory_space<vmem>>, vector<4x19x16xf32>
    %cst_17 = arith.constant 3.750000e-01 : f32
    %12 = vector.broadcast %cst_17 : f32 to vector<4x19x16xf32>
    %13 = arith.mulf %11, %12 : vector<4x19x16xf32>
    %14 = arith.addf %10, %13 : vector<4x19x16xf32>
    %c0_18 = arith.constant 0 : index
    %c0_19 = arith.constant 0 : index
    %c3 = arith.constant 3 : index
    %15 = vector.load %arg3[%c0_18, %c0_19, %c3] : memref<4x19x19xf32, #tpu.memory_space<vmem>>, vector<4x19x16xf32>
    %cst_20 = arith.constant 1.250000e-01 : f32
    %16 = vector.broadcast %cst_20 : f32 to vector<4x19x16xf32>
    %17 = arith.mulf %15, %16 : vector<4x19x16xf32>
    %18 = arith.addf %14, %17 : vector<4x19x16xf32>
    %c0_21 = arith.constant 0 : index
    %c0_22 = arith.constant 0 : index
    %c0_23 = arith.constant 0 : index
    %19 = vector.load %arg4[%c0_21, %c0_22, %c0_23] : memref<4x19x16xf32, #tpu.memory_space<vmem>>, vector<4x19x16xf32>
    tpu.vector_store %arg4[%c0_21, %c0_22, %c0_23], %18 {strides = array<i32>} : memref<4x19x16xf32, #tpu.memory_space<vmem>>, vector<4x19x16xf32>,
    %c0_24 = arith.constant 0 : index
    %c0_25 = arith.constant 0 : index
    %c0_26 = arith.constant 0 : index
    %20 = vector.load %arg4[%c0_24, %c0_25, %c0_26] : memref<4x19x16xf32, #tpu.memory_space<vmem>>, vector<4x16x16xf32>
    %cst_27 = arith.constant 5.000000e-01 : f32
    %21 = vector.broadcast %cst_27 : f32 to vector<4x16x16xf32>
    %22 = arith.mulf %20, %21 : vector<4x16x16xf32>
    %c0_28 = arith.constant 0 : index
    %c1_29 = arith.constant 1 : index
    %c0_30 = arith.constant 0 : index
    %23 = vector.load %arg4[%c0_28, %c1_29, %c0_30] : memref<4x19x16xf32, #tpu.memory_space<vmem>>, vector<4x16x16xf32>
    %cst_31 = arith.constant 1.500000e+00 : f32
    %24 = vector.broadcast %cst_31 : f32 to vector<4x16x16xf32>
    %25 = arith.mulf %23, %24 : vector<4x16x16xf32>
    %26 = arith.addf %22, %25 : vector<4x16x16xf32>
    %c0_32 = arith.constant 0 : index
    %c2_33 = arith.constant 2 : index
    %c0_34 = arith.constant 0 : index
    %27 = vector.load %arg4[%c0_32, %c2_33, %c0_34] : memref<4x19x16xf32, #tpu.memory_space<vmem>>, vector<4x16x16xf32>
    %cst_35 = arith.constant 1.500000e+00 : f32
    %28 = vector.broadcast %cst_35 : f32 to vector<4x16x16xf32>
    %29 = arith.mulf %27, %28 : vector<4x16x16xf32>
    %30 = arith.addf %26, %29 : vector<4x16x16xf32>
    %c0_36 = arith.constant 0 : index
    %c3_37 = arith.constant 3 : index
    %c0_38 = arith.constant 0 : index
    %31 = vector.load %arg4[%c0_36, %c3_37, %c0_38] : memref<4x19x16xf32, #tpu.memory_space<vmem>>, vector<4x16x16xf32>
    %cst_39 = arith.constant 5.000000e-01 : f32
    %32 = vector.broadcast %cst_39 : f32 to vector<4x16x16xf32>
    %33 = arith.mulf %31, %32 : vector<4x16x16xf32>
    %34 = arith.addf %30, %33 : vector<4x16x16xf32>
    %c0_40 = arith.constant 0 : index
    %c0_41 = arith.constant 0 : index
    %c0_42 = arith.constant 0 : index
    %35 = vector.load %arg2[%c0_40, %c0_41, %c0_42] : memref<4x16x16xf32, #tpu.memory_space<vmem>>, vector<4x16x16xf32>
    tpu.vector_store %arg2[%c0_40, %c0_41, %c0_42], %34 {strides = array<i32>} : memref<4x16x16xf32, #tpu.memory_space<vmem>>, vector<4x16x16xf32>,
    return
  }
  func.func @transform_0(%arg0: i32) -> (i32, i32, i32) {
    %c0_i32 = arith.constant 0 : i32
    %c0_i32_0 = arith.constant 0 : i32
    %c0_i32_1 = arith.constant 0 : i32
    return %arg0, %c0_i32, %c0_i32_0 : i32, i32, i32
  }
  func.func @transform_1(%arg0: i32) -> (i32, i32, i32) {
    %c0_i32 = arith.constant 0 : i32
    %c0_i32_0 = arith.constant 0 : i32
    %c0_i32_1 = arith.constant 0 : i32
    return %arg0, %c0_i32, %c0_i32_0 : i32, i32, i32
  }
}

</mosaic_0001>

<bundles_post_ra>
// kernel: tpu_custom_call.1
= control target key start
LH: loop header
LB: loop body
LE: loop exit
PB: predicated region body
PF: predicated region fallthrough
CT: control target
= control target key end

     0   :  { %6 = vsyncpa [#allocation5], 0  ;;  %s1031_s0 = inlined_call_operand.hbm [shape: f32[8,16,16], index: 0, kind: input, shape index: {}]   ;;  %s1032_s1 = inlined_call_operand.hbm [shape: f32[8,16,16], index: 1, kind: output, shape index: {}]  }
   0x1   :  { %8 = vsyncpa [#allocation5 + $0x1], 0 }
   0x2   :  { %9 = vsyncpa [#allocation6], 0 }
   0x3   :  { %11 = vsyncpa [#allocation6 + $0x1], 0  ;;  %s799_s6 = smov 0   ;;  %s801_s7 = smov 0  }
   0x4   :  { %s803_s8 = smov 0   ;;  %s805_s9 = smov 0  }
   0x5 LB: > { %s820_s10 = sadd.s32 4294967295, %s778_s9   ;;  %s607_s11 = sadd.s32 4294967294, %s778_s9   ;;  %s778_s9 = sphi %s805_s9, %s1042_s9   ;;  %s774_s8 = sphi %s803_s8, %s1041_s8   ;;  %s770_s7 = sphi %s801_s7, %s1040_s7   ;;  %s766_s6 = sphi %s799_s6, %s1039_s6  }
   0x6   : > { %s824_s12 = sadd.s32 1, %s778_s9   ;;  %s24_s13 = sadd.s32 1, %s774_s8 }
   0x7   : > { %s21_s14 = ssub.s32 %s778_s9, %s824_s12  ;;  %p31_p0 = scmp.ne.s32.totalorder %s774_s8, %s770_s7 }
   0x8   : > { %p22_p1 = scmp.eq.s32.totalorder %s21_s14, 0  ;;  %p32_p2 = scmp.eq.s32.totalorder %s778_s9, 0 }
   0x9   : > { %p37_p3 = scmp.ne.s32.totalorder %s770_s7, %s766_s6  ;;  %p38_p4 = scmp.eq.s32.totalorder %s820_s10, 0 }
   0xa   : > { %s836_s15 = scalar_select %p22_p1, %s774_s8, %s24_s13  }
   0xb   : > { %p838_p5 = por %p32_p2, %p31_p0  ;;  %p842_p6 = por %p38_p4, %p37_p3 }
   0xc   : > { %p61_p7 = scmp.eq.s32.totalorder %s820_s10, 1  ;;  %p67_p8 = scmp.eq.s32.totalorder %s607_s11, 1 }
   0xd   : > { %p639_p10 = scmp.lt.s32.totalorder %s778_s9, 2  ;;  %s87_s20 = sand.u32 1, %s774_s8  }
   0xe   : > { %p849_p11 = por %p61_p7, %p31_p0  ;;  %p853_p12 = por %p67_p8, %p37_p3 }
   0xf   : > { %s624_s21 = sshll.u32 %s778_s9, 6  ;;  %s610_s22 = sshll.u32 %s87_s20, 6 }
  0x10   : > { %s97_s25 = scalar_lea.hbm %s1031_s0, %s624_s21  ;;  %s91_s27 = scalar_lea.vmem [#allocation4], %s610_s22 }
  0x11   : > { %s98_s26 = sshll.u32 %s97_s25, 4  ;;  %s100_s28 = sshll.u32 %s91_s27, 4  ;;  %s99_s26 = int_to_ptr.hbm [resolvable:$true] %s98_s26  ;;  %s101_s28 = int_to_ptr.vmem [resolvable:$true] %s100_s28 }
  0x12   : > { %p864_p13 = pnand %p639_p10, %p838_p5  ;;  %p614_p0 = scmp.ge.s32.totalorder %s778_s9, 1 }
  0x13   : > { %p108_p1 = scmp.lt.s32.totalorder %s778_s9, 3  ;;  %s88_s30 = scalar_lea.sflag [#allocation5], %s87_s20 }
  0x14   : > { %s682_s2 = sshra.s32 %s99_s26, 4  ;;  %p686_p3 = pneg %p864_p13  ;;  %s683_s2 = int_to_ptr.hbm [resolvable:$true] %s682_s2 }
  0x15   : > { %s684_s3 = scalar_lea.hbm %s683_s2, 64  ;;  %s689_s11 = scalar_lea.hbm %s1031_s0, 128 }
  0x16   : > { %p685_p2 = scmp.ne.s32.totalorder %s683_s2, %s684_s3  ;;  %p690_p5 = scmp.lt.s32.totalorder %s683_s2, %s1031_s0 }
  0x17   : > { %p691_p8 = scmp.lt.s32.totalorder %s689_s11, %s684_s3 }
  0x18   : > { %p687_p4 = pnand %p686_p3, %p685_p2 }
  0x19   : > { %p692_p10 = por %p691_p8, %p690_p5 }
  0x1a   : > { %p688_p7 = pneg %p687_p4 }
  0x1c   : > { %p693_p9 = pnand %p692_p10, %p688_p7 }
  0x1e   : > { %696 = shalt.err (!%p693_p9)
}
  0x1f   : > { %s780_s16 = smov 128   ;;  %s781_s20 = smov 8  }
  0x20   : > { %634 = dma.hbm_to_vmem [thread:$0]  (!%p864_p13), %s99_s26, 1024, %s101_s28, %s88_s30, %s780_s16, %s780_s16, %s781_s20  }
  0x21   : > { %p109_p2 = pnand %p614_p0, %p108_p1 }
  0x22   : > { %s885_s21 = sand.u32 (!%p109_p2), 1, %s770_s7  }
  0x23   : > { %112 = sbr.rel (%p109_p2) target bundleno = 404 (0x194), region = 24  ;;  %s615_s22 = sshll.u32 (!%p109_p2), %s885_s21, 6 }
  0x24   : > { %s115_s23 = scalar_lea.sflag (!%p109_p2), [#allocation5], %s885_s21  ;;  %s118_s24 = scalar_lea.vmem (!%p109_p2), [#allocation4], %s615_s22 }
  0x28   : > { %757 = dma.done.wait (%p842_p6), %s115_s23, 1024  }
  0x29   : > { %759 = vsyncadd (%p842_p6), %s115_s23, 4294966272  ;;  %vm140_vm0 = vcmask 154624   ;;  %v782_v0 = vmov 0.0   ;;  %v156_v1 = vld [vmem:[%s118_s24 + $0x10] sm:$0xff]  ;;  %v154_v2 = vld [vmem:[%s118_s24] sm:$0xff]  ;;  %s783_s25 = smov 2  }
  0x2a   : > { %145 = vst.msk [vmem:[#allocation2 + $0x18] sm:$0xff] %vm140_vm0, %v782_v0  ;;  %174 = vrot.lane.b32.xlu1 %v156_v1, %s783_s25  ;;  %170 = vrot.lane.b32.xlu0 %v154_v2, %s783_s25  ;;  %v158_v3 = vld [vmem:[%s118_s24 + $0x20] sm:$0xff]  ;;  %v157_v4 = vld [vmem:[%s118_s24 + $0x18] sm:$0xff]  ;;  %vm143_vm1 = vcmask 149504   ;;  %vm194_vm2 = vcmask 146448   ;;  %s784_s17 = smov 127  }
  0x2b   : > { %146 = vst.msk [vmem:[#allocation2 + $0x20] sm:$0xff] %vm140_vm0, %v782_v0  ;;  %178 = vrot.lane.b32.xlu2 %v158_v3, %s783_s25  ;;  %v155_v5 = vld [vmem:[%s118_s24 + $0x8] sm:$0xff]  ;;  %v160_v7 = vld [vmem:[%s118_s24 + $0x30] sm:$0xff]  ;;  %v161_v8 = vld [vmem:[%s118_s24 + $0x38] sm:$0xff]  ;;  %s785_s26 = smov 126   ;;  %s786_s27 = smov 125  }
  0x2c   : > { %141 = vst.msk [vmem:[#allocation2] sm:$0xff] %vm140_vm0, %v782_v0  ;;  %v159_v6 = vld [vmem:[%s118_s24 + $0x28] sm:$0xff]  ;;  %vm407_vm3 = vcmask 130048   ;;  %vm410_vm4 = vcmask 124928   ;;  %s974_s28 = scalar_lea.vmem [#allocation7], %s615_s22  ;;  %s626_s29 = sshll.u32 %s820_s10, 6 }
  0x2d   : > { %142 = vst.msk [vmem:[#allocation2 + $0x8] sm:$0xff] %vm140_vm0, %v782_v0  ;;  %s530_s10 = scalar_lea.hbm %s1032_s1, %s626_s29  ;;  %s531_s3 = sshll.u32 %s974_s28, 4  ;;  %s532_s3 = int_to_ptr.vmem [resolvable:$true] %s531_s3 }
  0x2e   : > { %148 = vst.msk [vmem:[#allocation2 + $0x30] sm:$0xff] %vm140_vm0, %v782_v0  ;;  %s533_s4 = sshll.u32 %s530_s10, 4  ;;  %s518_s5 = scalar_lea.sflag [#allocation6], %s885_s21  ;;  %s534_s4 = int_to_ptr.hbm [resolvable:$true] %s533_s4 }
  0x2f   : > { %149 = vst.msk [vmem:[#allocation2 + $0x38] sm:$0xff] %vm140_vm0, %v782_v0  ;;  %s726_s11 = sshra.s32 %s534_s4, 4  ;;  %s732_s20 = scalar_lea.hbm %s1032_s1, 128  ;;  %s727_s11 = int_to_ptr.hbm [resolvable:$true] %s726_s11 }
  0x30   : > { %151 = vst.msk [vmem:[#allocation2 + $0x48] sm:$0xff] %vm140_vm0, %v782_v0  ;;  %s728_s13 = scalar_lea.hbm %s727_s11, 64  ;;  %p733_p0 = scmp.lt.s32.totalorder %s727_s11, %s1032_s1 }
  0x31   : > { %152 = vst.msk [vmem:[#allocation2 + $0x50] sm:$0xff] %vm140_vm0, %v782_v0  ;;  %p729_p6 = scmp.ne.s32.totalorder %s727_s11, %s728_s13  ;;  %p734_p1 = scmp.lt.s32.totalorder %s732_s20, %s728_s13 }
  0x32   : > { %176 = vrot.lane.b32.xlu1 %v157_v4, %s783_s25  ;;  %172 = vrot.lane.b32.xlu0 %v155_v5, %s783_s25  ;;  %147 = vst.msk [vmem:[#allocation2 + $0x28] sm:$0x7] %vm143_vm1, %v782_v0 }
  0x33   : > { %180 = vrot.lane.b32.xlu2 %v159_v6, %s783_s25  ;;  %144 = vst.msk [vmem:[#allocation2 + $0x10] sm:$0x7] %vm143_vm1, %v782_v0  ;;  %p730_p9 = pnand %p729_p6, %p849_p11  ;;  %p735_p3 = por %p734_p1, %p733_p0 }
  0x34   : > { %150 = vst.msk [vmem:[#allocation2 + $0x40] sm:$0x7] %vm143_vm1, %v782_v0 }
  0x35   : > { %153 = vst.msk [vmem:[#allocation2 + $0x58] sm:$0x7] %vm143_vm1, %v782_v0  ;;  %p731_p13 = pneg %p730_p9 }
  0x37   : > { %p736_p4 = pnand %p735_p3, %p731_p13 }
  0x3a   : > { %182 = vrot.lane.b32.xlu0 %v160_v7, %s783_s25  ;;  %184 = vrot.lane.b32.xlu1 %v161_v8, %s783_s25 }
  0x85   : > { %v179_v9 = vpop.permute.xlu2 %178 }
  0x86   : > { %199 = vst.msk [vmem:[#allocation2 + $0x32] sm:$0xff] %vm194_vm2, %v179_v9 }
  0x8d   : > { %v181_v10 = vpop.permute.xlu2 %180  ;;  %v209_v26 = vld [vmem:[#allocation2 + $0x30] sm:$0xff] }
  0x8e   : > { %200 = vst.msk [vmem:[#allocation2 + $0x3a] sm:$0xff] %vm194_vm2, %v181_v10  ;;  %v233_v29 = vmul.f32 0.375, %v209_v26  ;;  %v221_v47 = vmul.f32 0.125, %v209_v26 }
  0x95   : > { %v211_v31 = vld [vmem:[#allocation2 + $0x40] sm:$0x7]  ;;  %v210_v33 = vld [vmem:[#allocation2 + $0x38] sm:$0xff] }
  0x96   : > { %v235_v34 = vmul.f32 0.375, %v211_v31  ;;  %v234_v36 = vmul.f32 0.375, %v210_v33  ;;  %v927_v48 = vmul.f32 0.125, %v211_v31  ;;  %v929_v49 = vmul.f32 0.125, %v210_v33 }
  0x9c   : > { %v175_v11 = vpop.permute.xlu1 %174  ;;  %v171_v12 = vpop.permute.xlu0 %170 }
  0x9d   : > { %197 = vst.msk [vmem:[#allocation2 + $0x1a] sm:$0xff] %vm194_vm2, %v175_v11 }
  0x9e   : > { %195 = vst.msk [vmem:[#allocation2 + $0x2] sm:$0xff] %vm194_vm2, %v171_v12 }
  0xa4   : > { %v177_v13 = vpop.permute.xlu1 %176  ;;  %v173_v14 = vpop.permute.xlu0 %172  ;;  %v206_v17 = vld [vmem:[#allocation2 + $0x18] sm:$0xff] }
  0xa5   : > { %198 = vst.msk [vmem:[#allocation2 + $0x22] sm:$0xff] %vm194_vm2, %v177_v13  ;;  %v203_v15 = vld [vmem:[#allocation2] sm:$0xff]  ;;  %v230_v22 = vmul.f32 0.375, %v206_v17  ;;  %v218_v44 = vmul.f32 0.125, %v206_v17 }
  0xa6   : > { %196 = vst.msk [vmem:[#allocation2 + $0xa] sm:$0xff] %vm194_vm2, %v173_v14  ;;  %v227_v16 = vmul.f32 0.375, %v203_v15  ;;  %v215_v41 = vmul.f32 0.125, %v203_v15 }
  0xa8   : > { %251 = vrot.lane.b32.xlu2 %v227_v16, %s784_s17 }
  0xac   : > { %v183_v18 = vpop.permute.xlu0 %182  ;;  %v185_v19 = vpop.permute.xlu1 %184  ;;  %v208_v25 = vld [vmem:[#allocation2 + $0x28] sm:$0x7]  ;;  %v207_v27 = vld [vmem:[#allocation2 + $0x20] sm:$0xff] }
  0xad   : > { %v205_v20 = vld [vmem:[#allocation2 + $0x10] sm:$0x7]  ;;  %v204_v21 = vld [vmem:[#allocation2 + $0x8] sm:$0xff]  ;;  %201 = vst.msk [vmem:[#allocation2 + $0x4a] sm:$0xff] %vm194_vm2, %v183_v18  ;;  %v232_v28 = vmul.f32 0.375, %v208_v25  ;;  %v231_v30 = vmul.f32 0.375, %v207_v27 }
  0xae   : > { %v229_v23 = vmul.f32 0.375, %v205_v20  ;;  %v228_v24 = vmul.f32 0.375, %v204_v21  ;;  %202 = vst.msk [vmem:[#allocation2 + $0x52] sm:$0xff] %vm194_vm2, %v185_v19  ;;  %v915_v42 = vmul.f32 0.125, %v205_v20  ;;  %v917_v43 = vmul.f32 0.125, %v204_v21 }
  0xaf   : > { %v921_v45 = vmul.f32 0.125, %v208_v25  ;;  %v923_v46 = vmul.f32 0.125, %v207_v27 }
  0xb0   : > { %255 = vrot.lane.b32.xlu1 %v229_v23, %s784_s17  ;;  %253 = vrot.lane.b32.xlu0 %v228_v24, %s784_s17 }
  0xb1   : > { %257 = vrot.lane.b32.xlu2 %v230_v22, %s784_s17 }
  0xb4   : > { %v212_v32 = vld [vmem:[#allocation2 + $0x48] sm:$0xff] }
  0xb5   : > { %v236_v35 = vmul.f32 0.375, %v212_v32  ;;  %v214_v37 = vld [vmem:[#allocation2 + $0x58] sm:$0x7]  ;;  %v213_v38 = vld [vmem:[#allocation2 + $0x50] sm:$0xff]  ;;  %v224_v50 = vmul.f32 0.125, %v212_v32 }
  0xb6   : > { %v238_v39 = vmul.f32 0.375, %v214_v37  ;;  %v237_v40 = vmul.f32 0.375, %v213_v38  ;;  %v933_v52 = vmul.f32 0.125, %v214_v37  ;;  %v935_v53 = vmul.f32 0.125, %v213_v38 }
  0xb8   : > { %261 = vrot.lane.b32.xlu1 %v232_v28, %s784_s17  ;;  %259 = vrot.lane.b32.xlu0 %v231_v30, %s784_s17 }
  0xb9   : > { %263 = vrot.lane.b32.xlu2 %v233_v29, %s784_s17 }
  0xc0   : > { %267 = vrot.lane.b32.xlu1 %v235_v34, %s784_s17  ;;  %265 = vrot.lane.b32.xlu0 %v234_v36, %s784_s17 }
  0xc1   : > { %269 = vrot.lane.b32.xlu2 %v236_v35, %s784_s17 }
  0xc8   : > { %273 = vrot.lane.b32.xlu1 %v238_v39, %s784_s17  ;;  %271 = vrot.lane.b32.xlu0 %v237_v40, %s784_s17 }
  0xc9   : > { %299 = vrot.lane.b32.xlu2 %v227_v16, %s785_s26 }
  0xd0   : > { %303 = vrot.lane.b32.xlu1 %v229_v23, %s785_s26  ;;  %301 = vrot.lane.b32.xlu0 %v228_v24, %s785_s26 }
  0xd1   : > { %305 = vrot.lane.b32.xlu2 %v230_v22, %s785_s26 }
  0xd8   : > { %309 = vrot.lane.b32.xlu1 %v232_v28, %s785_s26  ;;  %307 = vrot.lane.b32.xlu0 %v231_v30, %s785_s26 }
  0xd9   : > { %311 = vrot.lane.b32.xlu2 %v233_v29, %s785_s26 }
  0xe0   : > { %315 = vrot.lane.b32.xlu1 %v235_v34, %s785_s26  ;;  %313 = vrot.lane.b32.xlu0 %v234_v36, %s785_s26 }
  0xe1   : > { %317 = vrot.lane.b32.xlu2 %v236_v35, %s785_s26 }
  0xe8   : > { %321 = vrot.lane.b32.xlu1 %v238_v39, %s785_s26  ;;  %319 = vrot.lane.b32.xlu0 %v237_v40, %s785_s26 }
  0xe9   : > { %359 = vrot.lane.b32.xlu2 %v215_v41, %s786_s27 }
  0xf0   : > { %363 = vrot.lane.b32.xlu1 %v915_v42, %s786_s27  ;;  %361 = vrot.lane.b32.xlu0 %v917_v43, %s786_s27 }
  0xf1   : > { %365 = vrot.lane.b32.xlu2 %v218_v44, %s786_s27 }
  0xf8   : > { %369 = vrot.lane.b32.xlu1 %v921_v45, %s786_s27  ;;  %367 = vrot.lane.b32.xlu0 %v923_v46, %s786_s27 }
  0xf9   : > { %371 = vrot.lane.b32.xlu2 %v221_v47, %s786_s27 }
 0x100   : > { %375 = vrot.lane.b32.xlu1 %v927_v48, %s786_s27  ;;  %373 = vrot.lane.b32.xlu0 %v929_v49, %s786_s27 }
 0x101   : > { %377 = vrot.lane.b32.xlu2 %v224_v50, %s786_s27 }
 0x102   : > { %v252_v51 = vpop.permute.xlu2 %251 }
 0x103   : > { %v287_v5 = vadd.f32 %v252_v51, %v215_v41 }
 0x108   : > { %381 = vrot.lane.b32.xlu1 %v933_v52, %s786_s27  ;;  %379 = vrot.lane.b32.xlu0 %v935_v53, %s786_s27 }
 0x10b   : > { %v258_v54 = vpop.permute.xlu2 %257 }
 0x10c   : > { %v290_v11 = vadd.f32 %v258_v54, %v218_v44 }
 0x113   : > { %v264_v55 = vpop.permute.xlu2 %263 }
 0x114   : > { %v293_v17 = vadd.f32 %v264_v55, %v221_v47 }
 0x11b   : > { %v270_v56 = vpop.permute.xlu2 %269 }
 0x11c   : > { %v296_v23 = vadd.f32 %v270_v56, %v224_v50 }
 0x122   : > { %v256_v57 = vpop.permute.xlu1 %255  ;;  %v254_v58 = vpop.permute.xlu0 %253 }
 0x123   : > { %v300_v59 = vpop.permute.xlu2 %299  ;;  %v289_v29 = vadd.f32 %v256_v57, %v915_v42  ;;  %v288_v30 = vadd.f32 %v254_v58, %v917_v43 }
 0x124   : > { %v335_v6 = vadd.f32 %v300_v59, %v287_v5 }
 0x12a   : > { %v262_v60 = vpop.permute.xlu1 %261  ;;  %v260_v61 = vpop.permute.xlu0 %259 }
 0x12b   : > { %v306_v62 = vpop.permute.xlu2 %305  ;;  %v292_v37 = vadd.f32 %v262_v60, %v921_v45  ;;  %v291_v38 = vadd.f32 %v260_v61, %v923_v46 }
 0x12c   : > { %v338_v12 = vadd.f32 %v306_v62, %v290_v11 }
 0x132   : > { %v939_v63 = vpop.permute.xlu1 %267  ;;  %v941_v0 = vpop.permute.xlu0 %265 }
 0x133   : > { %v312_v1 = vpop.permute.xlu2 %311  ;;  %v295_v46 = vadd.f32 %v939_v63, %v927_v48  ;;  %v294_v60 = vadd.f32 %v941_v0, %v929_v49 }
 0x134   : > { %v341_v18 = vadd.f32 %v312_v1, %v293_v17 }
 0x13a   : > { %v943_v2 = vpop.permute.xlu1 %273  ;;  %v945_v3 = vpop.permute.xlu0 %271 }
 0x13b   : > { %v318_v4 = vpop.permute.xlu2 %317  ;;  %v297_v17 = vadd.f32 %v945_v3, %v935_v53 }
 0x13c   : > { %v344_v24 = vadd.f32 %v318_v4, %v296_v23 }
 0x142   : > { %v304_v7 = vpop.permute.xlu1 %303  ;;  %v302_v8 = vpop.permute.xlu0 %301 }
 0x143   : > { %v360_v9 = vpop.permute.xlu2 %359  ;;  %v337_v31 = vadd.f32 %v304_v7, %v289_v29  ;;  %v336_v32 = vadd.f32 %v302_v8, %v288_v30 }
 0x144   : > { %v395_v10 = vadd.f32 %v360_v9, %v335_v6 }
 0x146   : > { %408 = vst.msk [vmem:[#allocation3] sm:$0xff] %vm407_vm3, %v395_v10 }
 0x14a   : > { %v310_v13 = vpop.permute.xlu1 %309  ;;  %v308_v14 = vpop.permute.xlu0 %307 }
 0x14b   : > { %v366_v15 = vpop.permute.xlu2 %365  ;;  %v340_v39 = vadd.f32 %v310_v13, %v292_v37  ;;  %v339_v40 = vadd.f32 %v308_v14, %v291_v38 }
 0x14c   : > { %v398_v16 = vadd.f32 %v366_v15, %v338_v12 }
 0x14d   : > { %v421_v43 = vld [vmem:[#allocation3] sm:$0xff] }
 0x14e   : > { %412 = vst.msk [vmem:[#allocation3 + $0x18] sm:$0xff] %vm407_vm3, %v398_v16  ;;  %v429_v55 = vmul.f32 0.5, %v421_v43  ;;  %v298_v16 = vadd.f32 %v943_v2, %v933_v52 }
 0x152   : > { %v316_v19 = vpop.permute.xlu1 %315  ;;  %v314_v20 = vpop.permute.xlu0 %313 }
 0x153   : > { %v372_v21 = vpop.permute.xlu2 %371  ;;  %v343_v7 = vadd.f32 %v316_v19, %v295_v46  ;;  %v342_v8 = vadd.f32 %v314_v20, %v294_v60 }
 0x154   : > { %v401_v22 = vadd.f32 %v372_v21, %v341_v18 }
 0x155   : > { %v423_v63 = vld [vmem:[#allocation3 + $0x18] sm:$0xff] }
 0x156   : > { %415 = vst.msk [vmem:[#allocation3 + $0x30] sm:$0xff] %vm407_vm3, %v401_v22  ;;  %v431_v18 = vmul.f32 0.5, %v423_v63 }
 0x15a   : > { %v950_v25 = vpop.permute.xlu1 %321  ;;  %v952_v26 = vpop.permute.xlu0 %319 }
 0x15b   : > { %v378_v27 = vpop.permute.xlu2 %377  ;;  %v346_v53 = vadd.f32 %v950_v25, %v298_v16  ;;  %v345_v3 = vadd.f32 %v952_v26, %v297_v17 }
 0x15c   : > { %v404_v28 = vadd.f32 %v378_v27, %v344_v24 }
 0x15e   : > { %418 = vst.msk [vmem:[#allocation3 + $0x48] sm:$0xff] %vm407_vm3, %v404_v28 }
 0x162   : > { %v364_v33 = vpop.permute.xlu1 %363  ;;  %v362_v34 = vpop.permute.xlu0 %361 }
 0x163   : > { %v397_v35 = vadd.f32 %v364_v33, %v337_v31  ;;  %v396_v36 = vadd.f32 %v362_v34, %v336_v32 }
 0x165   : > { %411 = vst.msk [vmem:[#allocation3 + $0x10] sm:$0x7] %vm410_vm4, %v397_v35 }
 0x166   : > { %409 = vst.msk [vmem:[#allocation3 + $0x8] sm:$0xff] %vm407_vm3, %v396_v36 }
 0x16a   : > { %v370_v41 = vpop.permute.xlu1 %369  ;;  %v368_v42 = vpop.permute.xlu0 %367 }
 0x16b   : > { %v400_v44 = vadd.f32 %v370_v41, %v340_v39  ;;  %v399_v47 = vadd.f32 %v368_v42, %v339_v40  ;;  %v425_v40 = vld [vmem:[#allocation3 + $0x30] sm:$0xff] }
 0x16c   : > { %v433_v42 = vmul.f32 0.5, %v425_v40 }
 0x16d   : > { %v422_v50 = vld [vmem:[#allocation3 + $0x8] sm:$0xff]  ;;  %414 = vst.msk [vmem:[#allocation3 + $0x28] sm:$0x7] %vm410_vm4, %v400_v44 }
 0x16e   : > { %v437_v51 = vld [vmem:[#allocation3 + $0x1] sm:$0xff]  ;;  %v438_v54 = vld [vmem:[#allocation3 + $0x9] sm:$0xff]  ;;  %v430_v56 = vmul.f32 0.5, %v422_v50  ;;  %413 = vst.msk [vmem:[#allocation3 + $0x20] sm:$0xff] %vm407_vm3, %v399_v47 }
 0x16f   : > { %v445_v57 = vmul.f32 1.5, %v437_v51  ;;  %v446_v58 = vmul.f32 1.5, %v438_v54  ;;  %v461_v59 = vld [vmem:[#allocation3 + $0x2] sm:$0xff]  ;;  %v462_v45 = vld [vmem:[#allocation3 + $0xa] sm:$0xff] }
 0x170   : > { %v485_v61 = vld [vmem:[#allocation3 + $0x3] sm:$0xff]  ;;  %v486_v62 = vld [vmem:[#allocation3 + $0xb] sm:$0xff]  ;;  %v469_v5 = vmul.f32 1.5, %v461_v59  ;;  %v470_v6 = vmul.f32 1.5, %v462_v45 }
 0x171   : > { %v453_v1 = vadd.f32 %v445_v57, %v429_v55  ;;  %v454_v4 = vadd.f32 %v446_v58, %v430_v56  ;;  %v493_v11 = vmul.f32 0.5, %v485_v61  ;;  %v494_v12 = vmul.f32 0.5, %v486_v62  ;;  %v427_v59 = vld [vmem:[#allocation3 + $0x48] sm:$0xff] }
 0x172   : > { %v376_v13 = vpop.permute.xlu1 %375  ;;  %v374_v48 = vpop.permute.xlu0 %373 }
 0x173   : > { %v477_v9 = vadd.f32 %v469_v5, %v453_v1  ;;  %v478_v10 = vadd.f32 %v470_v6, %v454_v4  ;;  %v403_v14 = vadd.f32 %v376_v13, %v343_v7  ;;  %v402_v15 = vadd.f32 %v374_v48, %v342_v8 }
 0x174   : > { %v435_v6 = vmul.f32 0.5, %v427_v59 }
 0x175   : > { %v501_v49 = vadd.f32 %v493_v11, %v477_v9  ;;  %v502_v0 = vadd.f32 %v494_v12, %v478_v10  ;;  %417 = vst.msk [vmem:[#allocation3 + $0x40] sm:$0x7] %vm410_vm4, %v403_v14  ;;  %v424_v19 = vld [vmem:[#allocation3 + $0x20] sm:$0xff] }
 0x176   : > { %v439_v20 = vld [vmem:[#allocation3 + $0x19] sm:$0xff]  ;;  %v440_v21 = vld [vmem:[#allocation3 + $0x21] sm:$0xff]  ;;  %v432_v22 = vmul.f32 0.5, %v424_v19  ;;  %416 = vst.msk [vmem:[#allocation3 + $0x38] sm:$0xff] %vm407_vm3, %v402_v15 }
 0x177   : > { %509 = vst.msk [vmem:[%s974_s28] sm:$0xff] %vm407_vm3, %v501_v49  ;;  %v447_v23 = vmul.f32 1.5, %v439_v20  ;;  %v448_v24 = vmul.f32 1.5, %v440_v21  ;;  %v463_v52 = vld [vmem:[#allocation3 + $0x1a] sm:$0xff]  ;;  %v464_v2 = vld [vmem:[#allocation3 + $0x22] sm:$0xff] }
 0x178   : > { %510 = vst.msk [vmem:[%s974_s28 + $0x8] sm:$0xff] %vm407_vm3, %v502_v0  ;;  %v487_v27 = vld [vmem:[#allocation3 + $0x1b] sm:$0xff]  ;;  %v488_v28 = vld [vmem:[#allocation3 + $0x23] sm:$0xff]  ;;  %v471_v31 = vmul.f32 1.5, %v463_v52  ;;  %v472_v32 = vmul.f32 1.5, %v464_v2 }
 0x179   : > { %v455_v29 = vadd.f32 %v447_v23, %v431_v18  ;;  %v456_v30 = vadd.f32 %v448_v24, %v432_v22  ;;  %v495_v33 = vmul.f32 0.5, %v487_v27  ;;  %v496_v34 = vmul.f32 0.5, %v488_v28 }
 0x17a   : > { %v382_v35 = vpop.permute.xlu1 %381  ;;  %v380_v36 = vpop.permute.xlu0 %379 }
 0x17b   : > { %v479_v37 = vadd.f32 %v471_v31, %v455_v29  ;;  %v480_v38 = vadd.f32 %v472_v32, %v456_v30  ;;  %v406_v39 = vadd.f32 %v382_v35, %v346_v53  ;;  %v405_v25 = vadd.f32 %v380_v36, %v345_v3 }
 0x17d   : > { %v503_v26 = vadd.f32 %v495_v33, %v479_v37  ;;  %v504_v41 = vadd.f32 %v496_v34, %v480_v38  ;;  %420 = vst.msk [vmem:[#allocation3 + $0x58] sm:$0x7] %vm410_vm4, %v406_v39  ;;  %v426_v43 = vld [vmem:[#allocation3 + $0x38] sm:$0xff] }
 0x17e   : > { %419 = vst.msk [vmem:[#allocation3 + $0x50] sm:$0xff] %vm407_vm3, %v405_v25  ;;  %v441_v44 = vld [vmem:[#allocation3 + $0x31] sm:$0xff]  ;;  %v442_v47 = vld [vmem:[#allocation3 + $0x39] sm:$0xff]  ;;  %v434_v50 = vmul.f32 0.5, %v426_v43 }
 0x17f   : > { %511 = vst.msk [vmem:[%s974_s28 + $0x10] sm:$0xff] %vm407_vm3, %v503_v26  ;;  %v449_v51 = vmul.f32 1.5, %v441_v44  ;;  %v450_v54 = vmul.f32 1.5, %v442_v47  ;;  %v465_v55 = vld [vmem:[#allocation3 + $0x32] sm:$0xff]  ;;  %v466_v56 = vld [vmem:[#allocation3 + $0x3a] sm:$0xff] }
 0x180   : > { %512 = vst.msk [vmem:[%s974_s28 + $0x18] sm:$0xff] %vm407_vm3, %v504_v41  ;;  %v489_v57 = vld [vmem:[#allocation3 + $0x33] sm:$0xff]  ;;  %v490_v58 = vld [vmem:[#allocation3 + $0x3b] sm:$0xff]  ;;  %v473_v60 = vmul.f32 1.5, %v465_v55  ;;  %v474_v61 = vmul.f32 1.5, %v466_v56 }
 0x181   : > { %v457_v45 = vadd.f32 %v449_v51, %v433_v42  ;;  %v458_v46 = vadd.f32 %v450_v54, %v434_v50  ;;  %v497_v4 = vmul.f32 0.5, %v489_v57  ;;  %v498_v5 = vmul.f32 0.5, %v490_v58 }
 0x183   : > { %v481_v62 = vadd.f32 %v473_v60, %v457_v45  ;;  %v482_v1 = vadd.f32 %v474_v61, %v458_v46 }
 0x185   : > { %v428_v7 = vld [vmem:[#allocation3 + $0x50] sm:$0xff]  ;;  %v505_v10 = vadd.f32 %v497_v4, %v481_v62  ;;  %v506_v11 = vadd.f32 %v498_v5, %v482_v1 }
 0x186   : > { %v443_v8 = vld [vmem:[#allocation3 + $0x49] sm:$0xff]  ;;  %v444_v9 = vld [vmem:[#allocation3 + $0x51] sm:$0xff]  ;;  %v436_v12 = vmul.f32 0.5, %v428_v7 }
 0x187   : > { %v451_v13 = vmul.f32 1.5, %v443_v8  ;;  %v467_v48 = vld [vmem:[#allocation3 + $0x4a] sm:$0xff]  ;;  %v468_v63 = vld [vmem:[#allocation3 + $0x52] sm:$0xff]  ;;  %v452_v14 = vmul.f32 1.5, %v444_v9  ;;  %513 = vst.msk [vmem:[%s974_s28 + $0x20] sm:$0xff] %vm407_vm3, %v505_v10 }
 0x188   : > { %v491_v49 = vld [vmem:[#allocation3 + $0x4b] sm:$0xff]  ;;  %v475_v15 = vmul.f32 1.5, %v467_v48  ;;  %v492_v16 = vld [vmem:[#allocation3 + $0x53] sm:$0xff]  ;;  %514 = vst.msk [vmem:[%s974_s28 + $0x28] sm:$0xff] %vm407_vm3, %v506_v11  ;;  %v476_v18 = vmul.f32 1.5, %v468_v63 }
 0x189   : > { %v459_v0 = vadd.f32 %v451_v13, %v435_v6  ;;  %v460_v17 = vadd.f32 %v452_v14, %v436_v12  ;;  %v499_v20 = vmul.f32 0.5, %v491_v49  ;;  %v500_v22 = vmul.f32 0.5, %v492_v16 }
 0x18b   : > { %v483_v19 = vadd.f32 %v475_v15, %v459_v0  ;;  %v484_v21 = vadd.f32 %v476_v18, %v460_v17 }
 0x18d   : > { %v507_v23 = vadd.f32 %v499_v20, %v483_v19  ;;  %v508_v24 = vadd.f32 %v500_v22, %v484_v21 }
 0x18f   : > { %515 = vst.msk [vmem:[%s974_s28 + $0x30] sm:$0xff] %vm407_vm3, %v507_v23 }
 0x190   : > { %516 = vst.msk [vmem:[%s974_s28 + $0x38] sm:$0xff] %vm407_vm3, %v508_v24 }
 0x191   : > { %739 = shalt.err (!%p736_p4)
}
 0x192   : > { %s787_s21 = smov 128   ;;  %s788_s24 = smov 8  }
 0x193   : > { %629 = dma.vmem_to_hbm [thread:$0]  (%p849_p11), %s532_s3, 1024, %s534_s4, %s518_s5, %s787_s21, %s787_s21, %s788_s24  }
 0x194 PF: > { %s548_s25 = sand.u32 1, %s766_s6   ;;  %p1038_p7 = scmp.ge.s32.totalorder %s778_s9, 2 }
 0x195   : > { %s549_s17 = scalar_lea.sflag [#allocation6], %s548_s25 }
 0x196   : > { %p636_p5 = pnand %p1038_p7, %p853_p12 }
 0x198   : > { %p637_p8 = pneg %p636_p5 }
 0x19a   : > { %761 = dma.done.wait (%p637_p8), %s549_s17, 1024  }
 0x19b   : > { %763 = vsyncadd (%p637_p8), %s549_s17, 4294966272  ;;  %p14_p10 = scmp.ge.s32.totalorder %s824_s12, 4   ;;  %s1039_s6 = smov %s770_s7 }
 0x19c   : > { %s1040_s7 = smov %s774_s8  ;;  %s1041_s8 = smov %s836_s15 }
 0x19d   : > { %s1042_s9 = smov %s824_s12  ;;  %16 = sbr.rel (!%p14_p10) target bundleno = 5 (0x5), region = 69 }
 0x1a2   :  { %555 = vsyncpa [#allocation5], 1 }
 0x1a3   :  { %557 = vsyncpa [#allocation5 + $0x1], 1 }
 0x1a4   :  { %558 = vsyncpa [#allocation6], 1 }
 0x1a5   :  { %560 = vsyncpa [#allocation6 + $0x1], 1 }

</bundles_post_ra>
